<compile_context>
chip_gen: v7x
topology: tpu7x:2x2x1
jax: 0.10.0
libtpu: 0.0.40
codegen_flags: <defaults>
</compile_context>

<pallas_src>
import jax
import jax.numpy as jnp
from jax.experimental import pallas as pl
from jax.experimental.pallas import tpu as pltpu

# Lane widths to try (largest first); all are multiples of 128 -> unmasked vst.
_LANE_CANDIDATES = (4096, 2048, 1024, 512, 384, 256, 128)
# Per-buffer (input tile + output tile) byte budget; double-buffered ~= 24 MiB.
_TILE_BYTES = 12 * 1024 * 1024
# Explicit scoped-VMEM limit: covers double buffering + headroom, < v7x 64 MiB.
_VMEM_LIMIT_BYTES = 40 * 1024 * 1024


def _to_float_kernel(x_ref, o_ref):
    # Elementwise cast of one VMEM tile: load -> cast -> store (VPU path).
    o_ref[...] = x_ref[...].astype(jnp.float32)


def _pick_tile_rows(rows, lanes, in_itemsize):
    """Dtype-aware row tile: keep double-buffered VMEM footprint constant."""
    budget_elems = _TILE_BYTES // (in_itemsize + 4)  # in_itemsize in + 4 out per elem
    tile_r = max(32, (budget_elems // lanes) // 32 * 32)  # multiple of 32 (uint8 packing)
    if rows <= tile_r:
        return rows  # single block covering the full array (block == array dims)
    return tile_r


def _cast_2d(x2d, tile_r):
    """Streaming f32 cast of a (rows, lanes) array, tiled over rows."""
    rows, lanes = x2d.shape
    in_itemsize = jnp.dtype(x2d.dtype).itemsize
    grid = (pl.cdiv(rows, tile_r),)  # partial last block handled by Pallas

    return pl.pallas_call(
        _to_float_kernel,
        out_shape=jax.ShapeDtypeStruct((rows, lanes), jnp.float32),
        grid=grid,
        in_specs=[pl.BlockSpec((tile_r, lanes), lambda i: (i, 0))],
        out_specs=pl.BlockSpec((tile_r, lanes), lambda i: (i, 0)),
        compiler_params=pltpu.CompilerParams(
            dimension_semantics=("parallel",),
            vmem_limit_bytes=_VMEM_LIMIT_BYTES,
        ),
        cost_estimate=pl.CostEstimate(
            flops=0,
            transcendentals=0,
            bytes_accessed=rows * lanes * (in_itemsize + 4),
        ),
    )(x2d)


def to_float(x):
    """Equivalent of PyTorch `x.float()`: cast any input dtype to float32."""
    orig_shape = x.shape
    total = int(x.size)
    if total == 0:
        return jnp.zeros(orig_shape, dtype=jnp.float32)

    in_itemsize = jnp.dtype(x.dtype).itemsize

    # Pick the widest lane count that exactly divides the element count so the
    # (rows, lanes) view is a free reshape of the contiguous array.
    lanes = next((l for l in _LANE_CANDIDATES if total % l == 0), None)

    if lanes is not None:
        # Aligned fast path: no padding, no output slicing -> ideal HBM traffic.
        rows = total // lanes
        x2d = x.reshape(rows, lanes)
        tile_r = _pick_tile_rows(rows, lanes, in_itemsize)
        out2d = _cast_2d(x2d, tile_r)
        return out2d.reshape(orig_shape)

    # Ragged fallback (total not a multiple of 128): pad the flat view up to a
    # multiple of 128 lanes. Only this rare path pays extra HBM copies.
    lanes = 128
    rows = pl.cdiv(total, lanes)
    padded_total = rows * lanes
    flat = jnp.pad(x.reshape(-1), (0, padded_total - total))
    x2d = flat.reshape(rows, lanes)
    tile_r = _pick_tile_rows(rows, lanes, in_itemsize)
    out2d = _cast_2d(x2d, tile_r)
    return out2d.reshape(-1)[:total].reshape(orig_shape)


if __name__ == "__main__":
    key = jax.random.PRNGKey(0)

    # Typical ToFloat use case: uint8 image tensor in NCHW (small test shape).
    x_int = jax.random.randint(key, (2, 4, 16, 16), 0, 256, dtype=jnp.int32).astype(
        jnp.uint8
    )
    y = jax.block_until_ready(to_float(x_int))
    assert y.dtype == jnp.float32
    assert y.shape == x_int.shape
    assert jnp.array_equal(y, x_int.astype(jnp.float32))

    # Floating-point input (bf16 -> f32), mirroring .float().
    x_bf16 = jax.random.normal(
        jax.random.PRNGKey(1), (2, 4, 16, 16), dtype=jnp.bfloat16
    )
    y2 = jax.block_until_ready(to_float(x_bf16))
    assert jnp.array_equal(y2, x_bf16.astype(jnp.float32))

    # Moderate input exercising the aligned no-pad path (lanes chosen from total).
    x_big = jax.random.randint(
        jax.random.PRNGKey(2), (2, 8, 256, 256), 0, 256, dtype=jnp.int32
    ).astype(jnp.uint8)
    y3 = jax.block_until_ready(to_float(x_big))
    assert jnp.array_equal(y3, x_big.astype(jnp.float32))

    # Directly exercise the multi-step grid with a ragged last row-block
    # (rows=100 not a multiple of tile_r=32) at a small size.
    x2d = jax.random.normal(jax.random.PRNGKey(4), (100, 256), dtype=jnp.bfloat16)
    y2d = jax.block_until_ready(_cast_2d(x2d, tile_r=32))
    assert jnp.array_equal(y2d, x2d.astype(jnp.float32))

    # Ragged-total case (105 elements, not a multiple of 128) -> pad fallback.
    x_ragged = jax.random.normal(jax.random.PRNGKey(3), (3, 5, 7), dtype=jnp.bfloat16)
    y4 = jax.block_until_ready(to_float(x_ragged))
    assert jnp.array_equal(y4, x_ragged.astype(jnp.float32))

    # float32 input (identity-valued cast) and int32 input.
    x_f32 = jax.random.normal(jax.random.PRNGKey(5), (2, 4, 16, 16), dtype=jnp.float32)
    assert jnp.array_equal(jax.block_until_ready(to_float(x_f32)), x_f32)
    x_i32 = jax.random.randint(jax.random.PRNGKey(6), (2, 4, 16, 16), -1000, 1000)
    assert jnp.array_equal(
        jax.block_until_ready(to_float(x_i32)), x_i32.astype(jnp.float32)
    )

    print("KERNEL_OK")
</pallas_src>

<mosaic_0001>
module attributes {stable_mosaic.version = 11 : i64} {
  func.func @_to_float_kernel(%arg0: i32, %arg1: memref<1x2048xi8, #tpu.memory_space<vmem>>, %arg2: memref<1x2048xf32, #tpu.memory_space<vmem>>) attributes {dimension_semantics = [#tpu.dimension_semantics<parallel>], iteration_bounds = array<i64: 1>, scalar_prefetch = 0 : i64, scratch_operands = 0 : i64, tpu.core_type = #tpu.core_type<tc>, window_params = [{transform_indices = @transform_0, window_bounds = array<i64: 1, 2048>}, {transform_indices = @transform_1, window_bounds = array<i64: 1, 2048>}]} {
    %c0 = arith.constant 0 : index
    %c0_0 = arith.constant 0 : index
    %0 = vector.load %arg1[%c0, %c0_0] : memref<1x2048xi8, #tpu.memory_space<vmem>>, vector<1x2048xi8>
    %1 = arith.uitofp %0 : vector<1x2048xi8> to vector<1x2048xf32>
    %c0_1 = arith.constant 0 : index
    %c0_2 = arith.constant 0 : index
    %2 = vector.load %arg2[%c0_1, %c0_2] : memref<1x2048xf32, #tpu.memory_space<vmem>>, vector<1x2048xf32>
    tpu.vector_store %arg2[%c0_1, %c0_2], %1 {strides = array<i32>} : memref<1x2048xf32, #tpu.memory_space<vmem>>, vector<1x2048xf32>,
    return
  }
  func.func @transform_0(%arg0: i32) -> (i32, i32) {
    %c0_i32 = arith.constant 0 : i32
    %c0_i32_0 = arith.constant 0 : i32
    return %arg0, %c0_i32 : i32, i32
  }
  func.func @transform_1(%arg0: i32) -> (i32, i32) {
    %c0_i32 = arith.constant 0 : i32
    %c0_i32_0 = arith.constant 0 : i32
    return %arg0, %c0_i32 : i32, i32
  }
}

</mosaic_0001>

<bundles_post_ra>
// kernel: tpu_custom_call.1
= control target key start
LH: loop header
LB: loop body
LE: loop exit
PB: predicated region body
PF: predicated region fallthrough
CT: control target
= control target key end

     0   :  { %6 = vsyncpa [#allocation3], 0  ;;  %s252_s0 = inlined_call_operand.hbm [shape: u8[1,2048], index: 0, kind: input, shape index: {}]   ;;  %s253_s1 = inlined_call_operand.hbm [shape: f32[1,2048], index: 1, kind: output, shape index: {}]  }
   0x1   :  { %7 = vsyncpa [#allocation4], 0  ;;  %s215_s6 = smov [#allocation2]   ;;  %s167_s10 = scalar_lea.hbm %s252_s0, 256 }
   0x2   :  { %s14_s7 = sshll.u32 %s215_s6, 4  ;;  %p168_p0 = scmp.ne.s32.totalorder %s252_s0, %s167_s10  ;;  %s15_s7 = int_to_ptr.vmem [resolvable:$true] %s14_s7 }
   0x3   :  { %p171_p1 = scmp.lt.u32.totalorder %s167_s10, %s252_s0 }
   0x5   :  { %p173_p2 = pnand %p171_p1, %p168_p0 }
   0x7   :  { %176 = shalt.err (!%p173_p2)
}
   0x8   :  { %s177_s15 = scalar_lea.vmem %s15_s7, 256  ;;  %p182_p4 = scmp.lt.s32.totalorder %s15_s7, %s15_s7 }
   0x9   :  { %p178_p3 = scmp.ne.s32.totalorder %s15_s7, %s177_s15  ;;  %p183_p5 = scmp.lt.s32.totalorder %s177_s15, %s177_s15 }
   0xb   :  { %p184_p6 = por %p183_p5, %p182_p4 }
   0xd   :  { %p185_p7 = pnand %p184_p6, %p178_p3 }
   0xf   :  { %188 = shalt.err (!%p185_p7)
}
  0x10   :  { %17 = dma.hbm_to_vmem [thread:$0]  %s252_s0, 256, %s15_s7, [#allocation3]  }
  0x11   :  { %211 = dma.done.wait [#allocation3], 256  }
  0x12   :  { %212 = vsyncadd [#allocation3], 4294967040  ;;  %v58_v0 = vlaneseq  ;;  %v216_v1 = vmov 1966171168   ;;  %v21_v5 = vld [vmem:[#allocation2] sm:$0xff]  ;;  %v22_v7 = vld [vmem:[#allocation2 + $0x8] sm:$0xff] }
  0x13   :  { %v56_v2 = vunpack.c.l.s4 %v216_v1  ;;  %v23_v8 = vunpack.c.0.s8 %v21_v5  ;;  %v24_v9 = vunpack.c.1.s8 %v21_v5  ;;  %v25_v10 = vunpack.c.2.s8 %v21_v5  ;;  %s217_s0 = smov [#allocation5]  }
  0x14   :  { %v59_v4 = vshrl.u32 %v58_v0, 7  ;;  %v26_v11 = vunpack.c.3.s8 %v21_v5  ;;  %v27_v12 = vunpack.c.0.s8 %v22_v7  ;;  %v28_v13 = vunpack.c.1.s8 %v22_v7  ;;  %s155_s18 = sshll.u32 %s217_s0, 4  ;;  %s156_s18 = int_to_ptr.vmem [resolvable:$true] %s155_s18 }
  0x15   :  { %v57_v3 = vunpack.c.0.s8 %v56_v2  ;;  %v29_v14 = vunpack.c.2.s8 %v22_v7  ;;  %v30_v15 = vunpack.c.3.s8 %v22_v7  ;;  %v31_v16 = vand.u32 255, %v23_v8  ;;  %s189_s19 = scalar_lea.vmem %s156_s18, 256  ;;  %p194_p9 = scmp.lt.s32.totalorder %s156_s18, %s156_s18 }
  0x16   :  { %v32_v17 = vand.u32 255, %v24_v9  ;;  %v33_v18 = vand.u32 255, %v25_v10  ;;  %v34_v19 = vand.u32 255, %v26_v11  ;;  %v35_v20 = vand.u32 255, %v27_v12  ;;  %p190_p8 = scmp.ne.s32.totalorder %s156_s18, %s189_s19  ;;  %p195_p10 = scmp.lt.s32.totalorder %s189_s19, %s189_s19 }
  0x17   :  { %v60_v6 = vsub.s32 %v57_v3, %v59_v4  ;;  %v36_v21 = vand.u32 255, %v28_v13  ;;  %v37_v22 = vand.u32 255, %v29_v14  ;;  %v38_v23 = vand.u32 255, %v30_v15 }
  0x18   :  { %v39_v24 = vcvt.s32.f32 %v31_v16  ;;  %v40_v25 = vcvt.s32.f32 %v32_v17  ;;  %v41_v26 = vcvt.s32.f32 %v33_v18  ;;  %v42_v27 = vcvt.s32.f32 %v34_v19  ;;  %p196_p11 = por %p195_p10, %p194_p9 }
  0x19   :  { %v43_v28 = vcvt.s32.f32 %v35_v20  ;;  %v44_v29 = vcvt.s32.f32 %v36_v21  ;;  %v45_v30 = vcvt.s32.f32 %v37_v22  ;;  %v46_v31 = vcvt.s32.f32 %v38_v23 }
  0x1a   :  { %v61_v32 = vrot.slane %v39_v24, %v60_v6  ;;  %v68_v33 = vrot.slane %v40_v25, %v60_v6  ;;  %v75_v34 = vrot.slane %v41_v26, %v60_v6  ;;  %v82_v35 = vrot.slane %v42_v27, %v60_v6  ;;  %p197_p12 = pnand %p196_p11, %p190_p8 }
  0x1b   :  { %v106_v36 = vrot.slane %v43_v28, %v60_v6  ;;  %v113_v37 = vrot.slane %v44_v29, %v60_v6  ;;  %v120_v38 = vrot.slane %v45_v30, %v60_v6  ;;  %v127_v39 = vrot.slane %v46_v31, %v60_v6 }
  0x1c   :  { %v83_v40 = vcombine.low %v61_v32, %v68_v33  ;;  %v84_v41 = vcombine.low %v75_v34, %v82_v35 }
  0x1d   :  { %v128_v42 = vcombine.low %v106_v36, %v113_v37  ;;  %v129_v43 = vcombine.low %v120_v38, %v127_v39 }
  0x1e   :  { %v91_v44 = vrot.slane %v83_v40, %v60_v6  ;;  %v98_v45 = vrot.slane %v84_v41, %v60_v6 }
  0x1f   :  { %v136_v46 = vrot.slane %v128_v42, %v60_v6  ;;  %v143_v47 = vrot.slane %v129_v43, %v60_v6 }
  0x20   :  { %v99_v48 = vcombine.low %v91_v44, %v98_v45 }
  0x21   :  { %v144_v49 = vcombine.low %v136_v46, %v143_v47 }
  0x22   :  { %147 = vst [vmem:[#allocation5] sm:$0xff] %v99_v48 }
  0x23   :  { %148 = vst [vmem:[#allocation5 + $0x8] sm:$0xff] %v144_v49 }
  0x24   :  { %200 = shalt.err (!%p197_p12)
}
  0x25   :  { %s201_s22 = scalar_lea.hbm %s253_s1, 256 }
  0x26   :  { %p202_p13 = scmp.ne.s32.totalorder %s253_s1, %s201_s22  ;;  %p205_p0 = scmp.lt.u32.totalorder %s201_s22, %s253_s1 }
  0x28   :  { %p207_p1 = pnand %p205_p0, %p202_p13 }
  0x2a   :  { %210 = shalt.err (!%p207_p1)
}
  0x2b   :  { %158 = dma.vmem_to_hbm [thread:$0]  %s156_s18, 256, %s253_s1, [#allocation4]  }
  0x2c   :  { %213 = dma.done.wait [#allocation4], 256  }
  0x2d   :  { %214 = vsyncadd [#allocation4], 4294967040 }
  0x2e   :  { %162 = vsyncpa [#allocation3], 1 }
  0x2f   :  { %163 = vsyncpa [#allocation4], 1 }

</bundles_post_ra>
